<compile_context>
chip_gen: v6e
topology: v6e:2x2x1
jax: 0.10.0
libtpu: 0.0.40
codegen_flags: <defaults>
</compile_context>

<pallas_src>
import functools
import math

import jax
import jax.numpy as jnp
from jax.experimental import pallas as pl
from jax.experimental.pallas import tpu as pltpu

_SQRT2 = 1.4142135623730951
_LANE_CAP = 8192           # widest lane dim we will relayout to
_TINY_FULL_BLOCK = 32768   # below this element count a (1, n) full-dim block is fine

_TRANSCENDENTAL = frozenset({"sigmoid", "tanh", "gelu", "elu", "silu", "swish"})
_FLOAT_ONLY = _TRANSCENDENTAL | frozenset({"leaky_relu"})


def _canonical(fn_name):
    # "F.leaky_relu" -> "leaky_relu", "torch.sigmoid" -> "sigmoid", ...
    return fn_name.split(".")[-1].lower()


def _apply_fn(x, name, params):
    """Elementwise activation dispatch, used INSIDE the Pallas kernel body."""
    p = params or {}
    if name == "relu":
        return jnp.maximum(x, 0)
    if name == "leaky_relu":
        slope = p.get("negative_slope", 0.01)
        return jnp.where(x >= 0, x, x * jnp.asarray(slope, x.dtype))
    if name == "sigmoid":
        return jax.nn.sigmoid(x)          # EUP-friendly + overflow-safe
    if name == "tanh":
        return jnp.tanh(x)
    if name == "gelu":
        if str(p.get("approximate", "none")) == "tanh":
            return jax.nn.gelu(x, approximate=True)
        # exact (erf) gelu, matching torch default approximate='none'
        return 0.5 * x * (1.0 + jax.lax.erf(x / jnp.asarray(_SQRT2, x.dtype)))
    if name == "elu":
        alpha = p.get("alpha", 1.0)
        # expm1 for precision near zero (review feedback)
        return jnp.where(x > 0, x, jnp.asarray(alpha, x.dtype) * jnp.expm1(x))
    if name in ("silu", "swish"):
        return x * jax.nn.sigmoid(x)
    # TODO(synk): arbitrary eval'd fn_name (non-elementwise torch callables) has no
    # generic Pallas equivalent; only the common activation set above is supported.
    raise NotImplementedError(f"unsupported fn_name={name}")


def _dynamic_active_kernel(x_ref, o_ref, *, name, params):
    o_ref[...] = _apply_fn(x_ref[...], name, params).astype(o_ref.dtype)


def _sublane_multiple(dtype):
    # f32 -> 8 rows/vreg, bf16 -> 16, int8/fp8 -> 32 (sub-32-bit packs along sublanes)
    return {4: 8, 2: 16, 1: 32}.get(jnp.dtype(dtype).itemsize, 8)


@functools.lru_cache(maxsize=None)
def _device_profile():
    """(block_bytes, vmem_limit_bytes, min_parallel_blocks) tuned per TPU generation."""
    block_bytes = 4 * 1024 * 1024         # v6e-ish default: ~4 MiB blocks, >=86% of roofline
    vmem_limit = 32 * 1024 * 1024
    min_blocks = 1
    try:
        kind = jax.devices()[0].device_kind.lower().replace(" ", "")
    except Exception:
        kind = ""
    if "v5lite" in kind or "v5e" in kind:
        block_bytes = 2 * 1024 * 1024     # v5e: ~0.8 TB/s HBM, per-step cost already <10%
    elif "v7" in kind or "tpu7" in kind:
        block_bytes = 8 * 1024 * 1024     # v7x: ~3.2 TB/s/TC -> bigger blocks amortize step cost
        vmem_limit = 48 * 1024 * 1024     # 8 MiB x (in+out) x double-buffer = 32 MiB < 64 MiB phys
        min_blocks = 2                    # 2 TCs/chip: keep both fed for medium arrays
    return block_bytes, vmem_limit, min_blocks


def _divisors_in_range(n, lo, hi):
    out = set()
    i = 1
    while i * i <= n:
        if n % i == 0:
            for d in (i, n // i):
                if lo <= d <= hi:
                    out.add(d)
        i += 1
    return out


@functools.lru_cache(maxsize=None)
def _choose_layout(n, sub):
    """Zero-copy (rows, lanes) 2-D view of an n-element flat array, or None -> pad fallback."""
    if n <= 1:
        return (1, max(n, 1))
    divs = _divisors_in_range(n, 128, min(_LANE_CAP, n))
    lane_dense = sorted((d for d in divs if d % 128 == 0), reverse=True)
    ragged = sorted((d for d in divs if d % 128 != 0), reverse=True)
    # Prefer lane-dense (multiple-of-128) widths; within a pool prefer widths whose row
    # count keeps full sublane occupancy (rows % sub == 0), then rows >= sub, then any.
    for pool in (lane_dense, ragged):
        for ok in (lambda r: r % sub == 0, lambda r: r >= sub, lambda r: True):
            for d in pool:
                if ok(n // d):
                    return (n // d, d)
    if n <= _TINY_FULL_BLOCK:
        return (1, n)   # small awkward sizes: one full-dim block, no pad / no extra copies
    return None


class DynamicActivePallas:
    """JAX/Pallas equivalent of DynamicActive_nnModule."""

    def __init__(self, fn_name, fn_params=None, *, donate_input=False,
                 block_bytes=None, vmem_limit_bytes=None):
        fn_params = dict() if fn_params is None else fn_params
        assert isinstance(fn_params, dict), (
            "`DynamicActivePallas` only supports `fn_params` as `dict` | "
            f"fn_name={fn_name} | fn_params={fn_params}"
        )
        self.fn_name = fn_name
        self.fn_params = fn_params
        # donate_input=True aliases the output onto the input HBM buffer
        # (only enable when the caller can actually donate the operand).
        self.donate_input = donate_input
        self._block_bytes_override = block_bytes
        self._vmem_limit_override = vmem_limit_bytes

    def __call__(self, x):
        name = _canonical(self.fn_name)
        if name in _FLOAT_ONLY and not jnp.issubdtype(x.dtype, jnp.floating):
            raise TypeError(
                f"{self.fn_name} is not implemented for non-floating dtype {x.dtype} "
                "(mirrors PyTorch behavior)"
            )

        orig_shape = x.shape
        dtype = x.dtype
        itemsize = jnp.dtype(dtype).itemsize
        sub = _sublane_multiple(dtype)
        n = int(math.prod(orig_shape)) if orig_shape else 1

        prof_block, prof_vmem, min_blocks = _device_profile()
        block_bytes = self._block_bytes_override or prof_block
        vmem_limit = self._vmem_limit_override or prof_vmem

        flat = x.reshape(-1)
        layout = _choose_layout(n, sub)
        pad = 0
        if layout is None:
            # TODO(synk): large arrays whose element count has no divisor in [128, 8192]
            # (prime-ish sizes) still take a wrapper pad + slice copy; an in-kernel
            # masked 1-D tail would make this zero-copy too.
            lanes = 128
            chunk = lanes * sub
            padded = ((n + chunk - 1) // chunk) * chunk
            pad = padded - n
            flat = jnp.pad(flat, (0, pad))
            rows = padded // lanes
        else:
            rows, lanes = layout
        x2d = flat.reshape(rows, lanes)

        # Row tile targeting ~block_bytes per block, rounded to the dtype sublane multiple.
        tile_rows = max(sub, (block_bytes // max(lanes * itemsize, 1)) // sub * sub)
        tile_rows = min(tile_rows, rows)

        # v7x: guarantee >= min_blocks sizable blocks so both TensorCores get work.
        if (min_blocks > 1 and rows > sub and n * itemsize > (1 << 20)
                and pl.cdiv(rows, tile_rows) < min_blocks):
            t = -(-rows // min_blocks)          # ceil(rows / min_blocks)
            t = -(-t // sub) * sub              # round up to sublane multiple
            tile_rows = min(max(sub, t), rows)

        if tile_rows >= rows:
            # Whole array in one block: full-dim block shape (always legal, even for a
            # non-128-multiple last dim), no pipelining overhead.
            tile_rows = rows
            grid = (1,)
        else:
            # Partial trailing block (rows % tile_rows != 0) is masked by Pallas.
            grid = (pl.cdiv(rows, tile_rows),)

        kernel = functools.partial(
            _dynamic_active_kernel, name=name, params=self.fn_params
        )
        cost = pl.CostEstimate(
            flops=2 * n,
            transcendentals=n if name in _TRANSCENDENTAL else 0,
            bytes_accessed=2 * n * itemsize,
        )

        out2d = pl.pallas_call(
            kernel,
            out_shape=jax.ShapeDtypeStruct((rows, lanes), dtype),
            grid_spec=pltpu.PrefetchScalarGridSpec(
                num_scalar_prefetch=0,
                grid=grid,
                in_specs=[pl.BlockSpec((tile_rows, lanes), lambda i: (i, 0))],
                out_specs=pl.BlockSpec((tile_rows, lanes), lambda i: (i, 0)),
            ),
            compiler_params=pltpu.CompilerParams(
                # parallel axis -> shards across v7x's two TensorCores for multi-block grids
                dimension_semantics=("parallel",),
                # explicit limit: v5e default scoped VMEM is only 16 MiB; our max
                # footprint (in+out, double-buffered) stays under the per-gen limit.
                vmem_limit_bytes=vmem_limit,
            ),
            cost_estimate=cost,
            input_output_aliases=({0: 0} if self.donate_input else {}),
        )(x2d)

        if pad:
            out2d = out2d.reshape(-1)[:n]
        return out2d.reshape(orig_shape)


if __name__ == "__main__":
    key = jax.random.PRNGKey(0)
    # NCHW input, matching PyTorch conv convention: [N=2, C=4, H=16, W=16]
    x = jax.random.normal(key, (2, 4, 16, 16), dtype=jnp.float32)

    module = DynamicActivePallas("F.leaky_relu", {"negative_slope": 0.1})
    y = jax.block_until_ready(module(x))
    ref = jnp.where(x >= 0, x, 0.1 * x)
    assert y.shape == x.shape and y.dtype == x.dtype
    assert jnp.max(jnp.abs(y - ref)) < 1e-6

    # single-block lane-dense path on a transcendental activation
    x2 = jax.random.normal(jax.random.PRNGKey(1), (3, 8, 72, 128), dtype=jnp.float32)
    y2 = jax.block_until_ready(DynamicActivePallas("torch.sigmoid")(x2))
    assert y2.shape == x2.shape
    assert jnp.max(jnp.abs(y2 - jax.nn.sigmoid(x2))) < 1e-5

    # force a small block size to exercise the multi-block pipelined grid + partial blocks
    mod3 = DynamicActivePallas("torch.tanh", block_bytes=64 * 1024)
    y3 = jax.block_until_ready(mod3(x2))
    assert jnp.max(jnp.abs(y3 - jnp.tanh(x2))) < 1e-5

    # awkward (non-128-multiple) element count: zero-copy full-dim block path (no pad/slice)
    x4 = jax.random.normal(jax.random.PRNGKey(2), (2, 3, 5, 7), dtype=jnp.float32)
    y4 = jax.block_until_ready(
        DynamicActivePallas("F.leaky_relu", {"negative_slope": 0.2})(x4)
    )
    assert y4.shape == x4.shape
    assert jnp.max(jnp.abs(y4 - jnp.where(x4 >= 0, x4, 0.2 * x4))) < 1e-6

    print("KERNEL_OK")
</pallas_src>

<mosaic_0001>
module attributes {stable_mosaic.version = 11 : i64} {
  func.func @_dynamic_active_kernel(%arg0: i32, %arg1: memref<8x256xf32, #tpu.memory_space<vmem>>, %arg2: memref<8x256xf32, #tpu.memory_space<vmem>>) attributes {dimension_semantics = [#tpu.dimension_semantics<parallel>], iteration_bounds = array<i64: 1>, scalar_prefetch = 0 : i64, scratch_operands = 0 : i64, tpu.core_type = #tpu.core_type<tc>, window_params = [{transform_indices = @transform_0, window_bounds = array<i64: 8, 256>}, {transform_indices = @transform_1, window_bounds = array<i64: 8, 256>}]} {
    %c0 = arith.constant 0 : index
    %c0_0 = arith.constant 0 : index
    %0 = vector.load %arg1[%c0, %c0_0] : memref<8x256xf32, #tpu.memory_space<vmem>>, vector<8x256xf32>
    %cst = arith.constant 0.000000e+00 : f32
    %1 = vector.broadcast %cst : f32 to vector<8x256xf32>
    %2 = arith.cmpf oge, %0, %1 : vector<8x256xf32>
    %cst_1 = arith.constant 1.000000e-01 : f32
    %3 = vector.broadcast %cst_1 : f32 to vector<8x256xf32>
    %4 = arith.mulf %0, %3 : vector<8x256xf32>
    %5 = arith.select %2, %0, %4 : vector<8x256xi1>, vector<8x256xf32>
    %c0_2 = arith.constant 0 : index
    %c0_3 = arith.constant 0 : index
    %6 = vector.load %arg2[%c0_2, %c0_3] : memref<8x256xf32, #tpu.memory_space<vmem>>, vector<8x256xf32>
    tpu.vector_store %arg2[%c0_2, %c0_3], %5 {strides = array<i32>} : memref<8x256xf32, #tpu.memory_space<vmem>>, vector<8x256xf32>,
    return
  }
  func.func @transform_0(%arg0: i32) -> (i32, i32) {
    %c0_i32 = arith.constant 0 : i32
    %c0_i32_0 = arith.constant 0 : i32
    return %arg0, %c0_i32 : i32, i32
  }
  func.func @transform_1(%arg0: i32) -> (i32, i32) {
    %c0_i32 = arith.constant 0 : i32
    %c0_i32_0 = arith.constant 0 : i32
    return %arg0, %c0_i32 : i32, i32
  }
}

</mosaic_0001>

<bundles_post_ra>
// kernel: tpu_custom_call.1
= control target key start
LH: loop header
LB: loop body
LE: loop exit
PB: predicated region body
PF: predicated region fallthrough
CT: control target
= control target key end

     0   :  { %6 = vsyncpa [#allocation3], 0  ;;  %s110_s0 = inlined_call_operand.hbm [shape: f32[8,256], index: 0, kind: input, shape index: {}]   ;;  %s111_s1 = inlined_call_operand.hbm [shape: f32[8,256], index: 1, kind: output, shape index: {}]  }
   0x1   :  { %7 = vsyncpa [#allocation4], 0  ;;  %s92_s6 = smov [#allocation2]  }
   0x2   :  { %s14_s7 = sshll.u32 %s92_s6, 4  ;;  %s15_s7 = int_to_ptr.vmem [resolvable:$true] %s14_s7 }
   0x3   :  { %s56_s8 = scalar_lea.vmem %s15_s7, 256  ;;  %p61_p1 = scmp.lt.s32.totalorder %s15_s7, %s15_s7 }
   0x4   :  { %p57_p0 = scmp.ne.s32.totalorder %s15_s7, %s56_s8  ;;  %p62_p2 = scmp.lt.s32.totalorder %s56_s8, %s56_s8 }
   0x6   :  { %p63_p3 = por %p62_p2, %p61_p1 }
   0x8   :  { %p64_p4 = pnand %p63_p3, %p57_p0 }
   0xa   :  { %67 = shalt.err (!%p64_p4)
}
   0xb   :  { %17 = dma.hbm_to_vmem [thread:$0]  %s110_s0, 256, %s15_s7, [#allocation3]  }
   0xc   :  { %88 = dma.done.wait [#allocation3], 256  }
   0xd   :  { %89 = vsyncadd [#allocation3], 4294967040  ;;  %s93_s11 = smov [#allocation5]   ;;  %v21_v0 = vld [vmem:[#allocation2] sm:$0xff]  ;;  %v22_v1 = vld [vmem:[#allocation2 + $0x8] sm:$0xff] }
   0xe   :  { %s37_s12 = sshll.u32 %s93_s11, 4  ;;  %vm23_vm0 = vcmp.ge.f32.partialorder %v21_v0, 0.0  ;;  %v25_v2 = vmul.f32 0.1, %v21_v0  ;;  %vm24_vm1 = vcmp.ge.f32.partialorder %v22_v1, 0.0  ;;  %s38_s12 = int_to_ptr.vmem [resolvable:$true] %s37_s12 }
   0xf   :  { %v26_v3 = vmul.f32 0.1, %v22_v1  ;;  %s68_s13 = scalar_lea.vmem %s38_s12, 256  ;;  %p73_p6 = scmp.lt.s32.totalorder %s38_s12, %s38_s12 }
  0x10   :  { %v27_v4 = vsel %vm23_vm0, %v21_v0, %v25_v2  ;;  %p69_p5 = scmp.ne.s32.totalorder %s38_s12, %s68_s13  ;;  %p74_p7 = scmp.lt.s32.totalorder %s68_s13, %s68_s13 }
  0x11   :  { %v28_v5 = vsel %vm24_vm1, %v22_v1, %v26_v3  ;;  %29 = vst [vmem:[#allocation5] sm:$0xff] %v27_v4 }
  0x12   :  { %30 = vst [vmem:[#allocation5 + $0x8] sm:$0xff] %v28_v5  ;;  %p75_p8 = por %p74_p7, %p73_p6 }
  0x14   :  { %p76_p9 = pnand %p75_p8, %p69_p5 }
  0x16   :  { %79 = shalt.err (!%p76_p9)
}
  0x17   :  { %40 = dma.vmem_to_hbm [thread:$0]  %s38_s12, 256, %s111_s1, [#allocation4]  }
  0x18   :  { %90 = dma.done.wait [#allocation4], 256  }
  0x19   :  { %91 = vsyncadd [#allocation4], 4294967040 }
  0x1a   :  { %44 = vsyncpa [#allocation3], 1 }
  0x1b   :  { %45 = vsyncpa [#allocation4], 1 }

</bundles_post_ra>
